<compile_context>
chip_gen: v5e
topology: v5e:2x2
jax: 0.10.0
libtpu: 0.0.40
codegen_flags: <defaults>
</compile_context>

<pallas_src>
import functools

import jax
import jax.numpy as jnp
from jax.experimental import pallas as pl
from jax.experimental.pallas import tpu as pltpu

LANE = 128          # lane width: feature dims padded to this for dense vld/vst
SUBLANE_BF16 = 16   # bf16 sublane pack: batch tile must be a multiple of this


def _round_up(n, m):
    return ((n + m - 1) // m) * m


def mlp_kernel(x_ref, w1_ref, b1_ref, w2_ref, b2_ref, w3_ref, b3_ref, o_ref):
    # Layer 1: bf16 x bf16 matmul on MXU, f32 accumulate; epilogue in f32 on VPU.
    h1 = jnp.dot(x_ref[...], w1_ref[...], preferred_element_type=jnp.float32)
    h1 = jnp.maximum(h1 + b1_ref[...], 0.0)
    # Layer 2: cast the f32 activation to bf16 only at the MXU input.
    h2 = jnp.dot(h1.astype(w2_ref.dtype), w2_ref[...],
                 preferred_element_type=jnp.float32)
    h2 = jnp.maximum(h2 + b2_ref[...], 0.0)
    # Layer 3: Linear (identity activation).  Store bf16 to halve writeback bytes.
    out = jnp.dot(h2.astype(w3_ref.dtype), w3_ref[...],
                  preferred_element_type=jnp.float32)
    o_ref[...] = (out + b3_ref[...]).astype(o_ref.dtype)


def prepare_params(w1, b1, w2, b2, w3, b3):
    """Pad feature dims to 128 lanes and cast weights to bf16 ONCE (hoisted out
    of the per-call path).  w_i are [in_i, out_i] (already transposed vs torch);
    b_i are [1, out_i]."""
    in_dim, h1_dim = w1.shape
    h2_dim = w2.shape[1]
    out_dim = w3.shape[1]
    IN, H1, H2, OUT = (_round_up(d, LANE) for d in (in_dim, h1_dim, h2_dim, out_dim))
    params = dict(
        w1=jnp.pad(w1, ((0, IN - in_dim), (0, H1 - h1_dim))).astype(jnp.bfloat16),
        w2=jnp.pad(w2, ((0, H1 - h1_dim), (0, H2 - h2_dim))).astype(jnp.bfloat16),
        w3=jnp.pad(w3, ((0, H2 - h2_dim), (0, OUT - out_dim))).astype(jnp.bfloat16),
        # Biases stay f32: the bias-add/ReLU epilogue runs in f32 on the VPU.
        b1=jnp.pad(b1, ((0, 0), (0, H1 - h1_dim))).astype(jnp.float32),
        b2=jnp.pad(b2, ((0, 0), (0, H2 - h2_dim))).astype(jnp.float32),
        b3=jnp.pad(b3, ((0, 0), (0, OUT - out_dim))).astype(jnp.float32),
    )
    return params, out_dim


@functools.partial(jax.jit, static_argnames=("out_dim", "block_batch"))
def mlp_forward(x, params, *, out_dim, block_batch=512):
    """x: [B, input_dim] f32; params: output of prepare_params."""
    B, in_dim = x.shape
    IN, H1 = params["w1"].shape
    H2 = params["w2"].shape[1]
    OUT = params["w3"].shape[1]
    assert block_batch % SUBLANE_BF16 == 0, "block_batch must be a multiple of 16"
    assert in_dim <= IN

    # ---- Adaptive batch tiling -------------------------------------------
    # Only pad the batch to the bf16 sublane pack (16), not to a fixed large
    # tile.  Use >=2 tiles whenever the batch allows so the "parallel" grid
    # axis can shard across v7x's two TensorCores; cap the tile at block_batch
    # for large B (bigger tiles amortize the ~0.35us per-grid-step overhead).
    Bp16 = _round_up(max(B, 1), SUBLANE_BF16)
    n_tiles = max(pl.cdiv(Bp16, block_batch),
                  2 if Bp16 >= 2 * SUBLANE_BF16 else 1)
    TB = _round_up(pl.cdiv(Bp16, n_tiles), SUBLANE_BF16)
    Bp = n_tiles * TB
    grid = (n_tiles,)

    # Pad/cast x inside the jit so it fuses with the pallas_call dispatch.
    xp = jnp.pad(x, ((0, Bp - B), (0, IN - in_dim))).astype(jnp.bfloat16)

    flops = 2 * Bp * (IN * H1 + H1 * H2 + H2 * OUT)
    bytes_accessed = (xp.size * 2
                      + (params["w1"].size + params["w2"].size + params["w3"].size) * 2
                      + (params["b1"].size + params["b2"].size + params["b3"].size) * 4
                      + Bp * OUT * 2)

    out = pl.pallas_call(
        mlp_kernel,
        out_shape=jax.ShapeDtypeStruct((Bp, OUT), jnp.bfloat16),
        grid=grid,
        in_specs=[
            pl.BlockSpec((TB, IN), lambda i: (i, 0)),   # activations: tiled over batch
            pl.BlockSpec((IN, H1), lambda i: (0, 0)),   # weights/biases: VMEM-resident
            pl.BlockSpec((1, H1), lambda i: (0, 0)),
            pl.BlockSpec((H1, H2), lambda i: (0, 0)),
            pl.BlockSpec((1, H2), lambda i: (0, 0)),
            pl.BlockSpec((H2, OUT), lambda i: (0, 0)),
            pl.BlockSpec((1, OUT), lambda i: (0, 0)),
        ],
        out_specs=pl.BlockSpec((TB, OUT), lambda i: (i, 0)),
        compiler_params=pltpu.CompilerParams(
            dimension_semantics=("parallel",),          # shard batch tiles across TCs
        ),
        cost_estimate=pl.CostEstimate(
            flops=flops, transcendentals=0, bytes_accessed=bytes_accessed),
    )(xp, params["w1"], params["b1"], params["w2"], params["b2"],
      params["w3"], params["b3"])

    # Strip batch/lane padding and restore the module's f32 output dtype.
    # Under jit this slice + convert fuses into a single small copy.
    return out[:B, :out_dim].astype(jnp.float32)


def init_linear(key, in_dim, out_dim):
    """Deterministic init mimicking torch.nn.Linear (uniform +/- 1/sqrt(in_dim))."""
    kw, kb = jax.random.split(key)
    bound = 1.0 / jnp.sqrt(jnp.float32(in_dim))
    # PyTorch stores weight as [out, in]; we keep it transposed as [in, out].
    w = jax.random.uniform(kw, (in_dim, out_dim), jnp.float32, -bound, bound)
    b = jax.random.uniform(kb, (1, out_dim), jnp.float32, -bound, bound)
    return w, b


if __name__ == "__main__":
    input_dim, hidden1_dim, hidden2_dim, output_dim = 32, 64, 48, 16
    batch = 8

    key = jax.random.PRNGKey(0)
    kx, k1, k2, k3 = jax.random.split(key, 4)

    x = jax.random.normal(kx, (batch, input_dim), jnp.float32)
    w1, b1 = init_linear(k1, input_dim, hidden1_dim)
    w2, b2 = init_linear(k2, hidden1_dim, hidden2_dim)
    w3, b3 = init_linear(k3, hidden2_dim, output_dim)

    # Pad + bf16-cast the weights exactly once (hoisted out of the call path).
    params, out_dim = prepare_params(w1, b1, w2, b2, w3, b3)

    out = mlp_forward(x, params, out_dim=out_dim)
    jax.block_until_ready(out)

    # Pure-JAX fp32 reference; tolerance loosened for bf16 matmul inputs/output.
    ref = jnp.maximum(x @ w1 + b1, 0.0)
    ref = jnp.maximum(ref @ w2 + b2, 0.0)
    ref = ref @ w3 + b3
    assert out.shape == (batch, output_dim)
    assert jnp.allclose(out, ref, atol=5e-2, rtol=5e-2), \
        float(jnp.max(jnp.abs(out - ref)))

    print("KERNEL_OK")
</pallas_src>

<mosaic_0001>
module attributes {stable_mosaic.version = 11 : i64} {
  func.func @mlp_kernel(%arg0: i32, %arg1: memref<16x128xbf16, #tpu.memory_space<vmem>>, %arg2: memref<128x128xbf16, #tpu.memory_space<vmem>>, %arg3: memref<1x128xf32, #tpu.memory_space<vmem>>, %arg4: memref<128x128xbf16, #tpu.memory_space<vmem>>, %arg5: memref<1x128xf32, #tpu.memory_space<vmem>>, %arg6: memref<128x128xbf16, #tpu.memory_space<vmem>>, %arg7: memref<1x128xf32, #tpu.memory_space<vmem>>, %arg8: memref<16x128xbf16, #tpu.memory_space<vmem>>) attributes {dimension_semantics = [#tpu.dimension_semantics<parallel>], iteration_bounds = array<i64: 1>, scalar_prefetch = 0 : i64, scratch_operands = 0 : i64, tpu.core_type = #tpu.core_type<tc>, window_params = [{transform_indices = @transform_0, window_bounds = array<i64: 16, 128>}, {pipeline_mode = #tpu.pipeline_mode<synchronous>, transform_indices = @transform_1, window_bounds = array<i64: 128, 128>}, {pipeline_mode = #tpu.pipeline_mode<synchronous>, transform_indices = @transform_2, window_bounds = array<i64: 1, 128>}, {pipeline_mode = #tpu.pipeline_mode<synchronous>, transform_indices = @transform_3, window_bounds = array<i64: 128, 128>}, {pipeline_mode = #tpu.pipeline_mode<synchronous>, transform_indices = @transform_4, window_bounds = array<i64: 1, 128>}, {pipeline_mode = #tpu.pipeline_mode<synchronous>, transform_indices = @transform_5, window_bounds = array<i64: 128, 128>}, {pipeline_mode = #tpu.pipeline_mode<synchronous>, transform_indices = @transform_6, window_bounds = array<i64: 1, 128>}, {transform_indices = @transform_7, window_bounds = array<i64: 16, 128>}]} {
    %c0 = arith.constant 0 : index
    %c0_0 = arith.constant 0 : index
    %0 = vector.load %arg1[%c0, %c0_0] : memref<16x128xbf16, #tpu.memory_space<vmem>>, vector<16x128xbf16>
    %c0_1 = arith.constant 0 : index
    %c0_2 = arith.constant 0 : index
    %1 = vector.load %arg2[%c0_1, %c0_2] : memref<128x128xbf16, #tpu.memory_space<vmem>>, vector<128x128xbf16>
    %cst = arith.constant dense<0.000000e+00> : vector<16x128xf32>
    %2 = tpu.matmul %0, %1, %cst {dimension_numbers = #tpu.dot_dimension_numbers<[1], [0], [0], [1], [0, 0, 1, 1], [], []>} : vector<16x128xbf16>, vector<128x128xbf16>, vector<16x128xf32> -> vector<16x128xf32>
    %c0_3 = arith.constant 0 : index
    %c0_4 = arith.constant 0 : index
    %3 = vector.load %arg3[%c0_3, %c0_4] : memref<1x128xf32, #tpu.memory_space<vmem>>, vector<1x128xf32>
    %4 = vector.broadcast %3 : vector<1x128xf32> to vector<16x128xf32>
    %5 = arith.addf %2, %4 : vector<16x128xf32>
    %cst_5 = arith.constant 0.000000e+00 : f32
    %6 = vector.broadcast %cst_5 : f32 to vector<16x128xf32>
    %7 = arith.maximumf %5, %6 : vector<16x128xf32>
    %8 = arith.truncf %7 : vector<16x128xf32> to vector<16x128xbf16>
    %c0_6 = arith.constant 0 : index
    %c0_7 = arith.constant 0 : index
    %9 = vector.load %arg4[%c0_6, %c0_7] : memref<128x128xbf16, #tpu.memory_space<vmem>>, vector<128x128xbf16>
    %cst_8 = arith.constant dense<0.000000e+00> : vector<16x128xf32>
    %10 = tpu.matmul %8, %9, %cst_8 {dimension_numbers = #tpu.dot_dimension_numbers<[1], [0], [0], [1], [0, 0, 1, 1], [], []>} : vector<16x128xbf16>, vector<128x128xbf16>, vector<16x128xf32> -> vector<16x128xf32>
    %c0_9 = arith.constant 0 : index
    %c0_10 = arith.constant 0 : index
    %11 = vector.load %arg5[%c0_9, %c0_10] : memref<1x128xf32, #tpu.memory_space<vmem>>, vector<1x128xf32>
    %12 = vector.broadcast %11 : vector<1x128xf32> to vector<16x128xf32>
    %13 = arith.addf %10, %12 : vector<16x128xf32>
    %cst_11 = arith.constant 0.000000e+00 : f32
    %14 = vector.broadcast %cst_11 : f32 to vector<16x128xf32>
    %15 = arith.maximumf %13, %14 : vector<16x128xf32>
    %16 = arith.truncf %15 : vector<16x128xf32> to vector<16x128xbf16>
    %c0_12 = arith.constant 0 : index
    %c0_13 = arith.constant 0 : index
    %17 = vector.load %arg6[%c0_12, %c0_13] : memref<128x128xbf16, #tpu.memory_space<vmem>>, vector<128x128xbf16>
    %cst_14 = arith.constant dense<0.000000e+00> : vector<16x128xf32>
    %18 = tpu.matmul %16, %17, %cst_14 {dimension_numbers = #tpu.dot_dimension_numbers<[1], [0], [0], [1], [0, 0, 1, 1], [], []>} : vector<16x128xbf16>, vector<128x128xbf16>, vector<16x128xf32> -> vector<16x128xf32>
    %c0_15 = arith.constant 0 : index
    %c0_16 = arith.constant 0 : index
    %19 = vector.load %arg7[%c0_15, %c0_16] : memref<1x128xf32, #tpu.memory_space<vmem>>, vector<1x128xf32>
    %20 = vector.broadcast %19 : vector<1x128xf32> to vector<16x128xf32>
    %21 = arith.addf %18, %20 : vector<16x128xf32>
    %22 = arith.truncf %21 : vector<16x128xf32> to vector<16x128xbf16>
    %c0_17 = arith.constant 0 : index
    %c0_18 = arith.constant 0 : index
    %23 = vector.load %arg8[%c0_17, %c0_18] : memref<16x128xbf16, #tpu.memory_space<vmem>>, vector<16x128xbf16>
    tpu.vector_store %arg8[%c0_17, %c0_18], %22 {strides = array<i32>} : memref<16x128xbf16, #tpu.memory_space<vmem>>, vector<16x128xbf16>,
    return
  }
  func.func @transform_0(%arg0: i32) -> (i32, i32) {
    %c0_i32 = arith.constant 0 : i32
    %c0_i32_0 = arith.constant 0 : i32
    return %arg0, %c0_i32 : i32, i32
  }
  func.func @transform_1(%arg0: i32) -> (i32, i32) {
    %c0_i32 = arith.constant 0 : i32
    %c0_i32_0 = arith.constant 0 : i32
    %c0_i32_1 = arith.constant 0 : i32
    return %c0_i32, %c0_i32_0 : i32, i32
  }
  func.func @transform_2(%arg0: i32) -> (i32, i32) {
    %c0_i32 = arith.constant 0 : i32
    %c0_i32_0 = arith.constant 0 : i32
    %c0_i32_1 = arith.constant 0 : i32
    return %c0_i32, %c0_i32_0 : i32, i32
  }
  func.func @transform_3(%arg0: i32) -> (i32, i32) {
    %c0_i32 = arith.constant 0 : i32
    %c0_i32_0 = arith.constant 0 : i32
    %c0_i32_1 = arith.constant 0 : i32
    return %c0_i32, %c0_i32_0 : i32, i32
  }
  func.func @transform_4(%arg0: i32) -> (i32, i32) {
    %c0_i32 = arith.constant 0 : i32
    %c0_i32_0 = arith.constant 0 : i32
    %c0_i32_1 = arith.constant 0 : i32
    return %c0_i32, %c0_i32_0 : i32, i32
  }
  func.func @transform_5(%arg0: i32) -> (i32, i32) {
    %c0_i32 = arith.constant 0 : i32
    %c0_i32_0 = arith.constant 0 : i32
    %c0_i32_1 = arith.constant 0 : i32
    return %c0_i32, %c0_i32_0 : i32, i32
  }
  func.func @transform_6(%arg0: i32) -> (i32, i32) {
    %c0_i32 = arith.constant 0 : i32
    %c0_i32_0 = arith.constant 0 : i32
    %c0_i32_1 = arith.constant 0 : i32
    return %c0_i32, %c0_i32_0 : i32, i32
  }
  func.func @transform_7(%arg0: i32) -> (i32, i32) {
    %c0_i32 = arith.constant 0 : i32
    %c0_i32_0 = arith.constant 0 : i32
    return %arg0, %c0_i32 : i32, i32
  }
}

</mosaic_0001>

<bundles_post_ra>
// kernel: mlp_forward.1
= control target key start
LH: loop header
LB: loop body
LE: loop exit
PB: predicated region body
PF: predicated region fallthrough
CT: control target
= control target key end

     0   :  { %12 = vsyncpa [#allocation3], 0  ;;  %s626_s0 = inlined_call_operand.vmem [shape: bf16[16,128], index: 0, kind: input, shape index: {}]   ;;  %s627_s1 = inlined_call_operand.hbm [shape: bf16[128,128], index: 1, kind: input, shape index: {}]   ;;  %s628_s2 = inlined_call_operand.vmem [shape: f32[1,128], index: 2, kind: input, shape index: {}]   ;;  %s629_s3 = inlined_call_operand.hbm [shape: bf16[128,128], index: 3, kind: input, shape index: {}]   ;;  %s630_s4 = inlined_call_operand.vmem [shape: f32[1,128], index: 4, kind: input, shape index: {}]   ;;  %s631_s5 = inlined_call_operand.hbm [shape: bf16[128,128], index: 5, kind: input, shape index: {}]   ;;  %s632_s6 = inlined_call_operand.vmem [shape: f32[1,128], index: 6, kind: input, shape index: {}]   ;;  %s633_s7 = inlined_call_operand.vmem [shape: bf16[16,128], index: 7, kind: output, shape index: {}]  }
   0x1   :  { %13 = vsyncpa [#allocation5], 0  ;;  %s35_s26 = sshll.u32 %s629_s3, 4  ;;  %s557_s27 = smov [#allocation4]   ;;  %s36_s26 = int_to_ptr.hbm [resolvable:$true] %s35_s26 }
   0x2   :  { %s37_s28 = sshll.u32 %s557_s27, 4  ;;  %s20_s8 = sshll.u32 %s627_s1, 4  ;;  %s38_s28 = int_to_ptr.vmem [resolvable:$true] %s37_s28  ;;  %s21_s8 = int_to_ptr.hbm [resolvable:$true] %s20_s8 }
   0x3   :  { %s558_s9 = smov 64   ;;  %s559_s10 = smov 4  }
   0x4   :  { %43 = dma.hbm_to_vmem [thread:$0]  %s36_s26, 1024, %s38_s28, [#allocation5], %s558_s9, %s558_s9, %s559_s10  }
   0x5   :  { %s560_s11 = smov [#allocation2]   ;;  %s50_s15 = sshll.u32 %s631_s5, 4  ;;  %s51_s15 = int_to_ptr.hbm [resolvable:$true] %s50_s15 }
   0x6   :  { %s22_s12 = sshll.u32 %s560_s11, 4  ;;  %s561_s3 = smov [#allocation6]   ;;  %s23_s12 = int_to_ptr.vmem [resolvable:$true] %s22_s12 }
   0x7   :  { %28 = dma.hbm_to_vmem [thread:$0]  %s21_s8, 1024, %s23_s12, [#allocation3], %s558_s9, %s558_s9, %s559_s10  }
   0x8   :  { %s52_s16 = sshll.u32 %s561_s3, 4  ;;  %s53_s16 = int_to_ptr.vmem [resolvable:$true] %s52_s16 }
   0x9   :  { %58 = dma.hbm_to_vmem [thread:$0]  %s51_s15, 1024, %s53_s16, [#allocation5], %s558_s9, %s558_s9, %s559_s10  }
   0xa   :  { %553 = dma.done.wait [#allocation3], 1024  }
   0xb   :  { %554 = vsyncadd [#allocation3], 4294966272 }
   0xc   :  { %555 = dma.done.wait [#allocation5], 2048  }
   0xd   :  { %556 = vsyncadd [#allocation5], 4294965248  ;;  %v451_v0 = vld [vmem:[#allocation2 + $0x38] sm:$0xff]  ;;  %v450_v1 = vld [vmem:[#allocation2 + $0x30] sm:$0xff] }
   0xe   :  { %149 = vmatpush.bf16.msra.mxu0 %v451_v0  ;;  %v459_v2 = vld [vmem:[#allocation4 + $0x38] sm:$0xff]  ;;  %v458_v3 = vld [vmem:[#allocation4 + $0x30] sm:$0xff]  ;;  %v449_v4 = vld [vmem:[#allocation2 + $0x28] sm:$0xff] }
   0xf   :  { %234 = vmatpush.bf16.msra.mxu1 %v459_v2  ;;  %v457_v5 = vld [vmem:[#allocation4 + $0x28] sm:$0xff]  ;;  %v448_v6 = vld [vmem:[#allocation2 + $0x20] sm:$0xff]  ;;  %v447_v8 = vld [vmem:[#allocation2 + $0x18] sm:$0xff] }
  0x10   :  { %v456_v7 = vld [vmem:[#allocation4 + $0x20] sm:$0xff]  ;;  %v446_v9 = vld [vmem:[#allocation2 + $0x10] sm:$0xff]  ;;  %v445_v10 = vld [vmem:[#allocation2 + $0x8] sm:$0xff] }
  0x11   :  { %v444_v11 = vld [vmem:[#allocation2] sm:$0xff]  ;;  %v455_v13 = vld [vmem:[#allocation4 + $0x18] sm:$0xff]  ;;  %v454_v14 = vld [vmem:[#allocation4 + $0x10] sm:$0xff] }
  0x12   :  { %150 = vmatpush.bf16.msra.mxu0 %v450_v1  ;;  %v443_v12 = vld [vmem:[%s626_s0] sm:$0xff]  ;;  %v453_v15 = vld [vmem:[#allocation4 + $0x8] sm:$0xff]  ;;  %v467_v17 = vld [vmem:[#allocation6 + $0x38] sm:$0xff] }
  0x13   :  { %235 = vmatpush.bf16.msra.mxu1 %v458_v3  ;;  %v452_v16 = vld [vmem:[#allocation4] sm:$0xff]  ;;  %319 = vmatpush.bf16.msra.mxu2 %v467_v17  ;;  %v466_v18 = vld [vmem:[#allocation6 + $0x30] sm:$0xff]  ;;  %v465_v19 = vld [vmem:[#allocation6 + $0x28] sm:$0xff] }
  0x14   :  { %v464_v20 = vld [vmem:[#allocation6 + $0x20] sm:$0xff]  ;;  %v463_v29 = vld [vmem:[#allocation6 + $0x18] sm:$0xff]  ;;  %v462_v30 = vld [vmem:[#allocation6 + $0x10] sm:$0xff] }
  0x15   :  { %v478_v22 = vld [vmem:[%s628_s2] ss:$0 sm:$0xff]  ;;  %v461_v31 = vld [vmem:[#allocation6 + $0x8] sm:$0xff] }
  0x16   :  { %151 = vmatpush.bf16.msra.mxu0 %v449_v4  ;;  %v460_v32 = vld [vmem:[#allocation6] sm:$0xff] }
  0x17   :  { %236 = vmatpush.bf16.msra.mxu1 %v457_v5  ;;  %320 = vmatpush.bf16.msra.mxu2 %v466_v18  ;;  %v479_v34 = vld [vmem:[%s630_s4] ss:$0 sm:$0xff] }
  0x18   :  { %v480_v42 = vld [vmem:[%s632_s6] ss:$0 sm:$0xff] }
  0x1a   :  { %152 = vmatpush.bf16.msra.mxu0 %v448_v6 }
  0x1b   :  { %237 = vmatpush.bf16.msra.mxu1 %v456_v7  ;;  %321 = vmatpush.bf16.msra.mxu2 %v465_v19 }
  0x1e   :  { %153 = vmatpush.bf16.msra.mxu0 %v447_v8 }
  0x1f   :  { %238 = vmatpush.bf16.msra.mxu1 %v455_v13  ;;  %322 = vmatpush.bf16.msra.mxu2 %v464_v20 }
  0x22   :  { %154 = vmatpush.bf16.msra.mxu0 %v446_v9 }
  0x23   :  { %239 = vmatpush.bf16.msra.mxu1 %v454_v14  ;;  %323 = vmatpush.bf16.msra.mxu2 %v463_v29 }
  0x26   :  { %155 = vmatpush.bf16.msra.mxu0 %v445_v10 }
  0x27   :  { %240 = vmatpush.bf16.msra.mxu1 %v453_v15  ;;  %324 = vmatpush.bf16.msra.mxu2 %v462_v30 }
  0x2a   :  { %156 = vmatpush.bf16.msra.mxu0 %v444_v11 }
  0x2b   :  { %241 = vmatpush.bf16.msra.mxu1 %v452_v16  ;;  %325 = vmatpush.bf16.msra.mxu2 %v461_v31 }
  0x2d   :  { %157 = vmatmul.bf16.vlgmr.msra.gmra.mxu0 %v443_v12 }
  0x2f   :  { %326 = vmatpush.bf16.msra.mxu2 %v460_v32 }
  0xaa   :  { %v158_v21 = vpop.f32.mrf.mxu0 }
  0xab   :  { %v159_v23 = vadd.f32 %v478_v22, %v158_v21 }
  0xad   :  { %v163_v26 = vmax.f32 %v159_v23, 0.0 }
  0xb2   :  { %v160_v24 = vpop.f32.mrf.mxu0 }
  0xb3   :  { %v161_v25 = vadd.f32 %v478_v22, %v160_v24 }
  0xb5   :  { %v164_v27 = vmax.f32 %v161_v25, 0.0 }
  0xb7   :  { %v165_v28 = vpack.c.bf16 %v164_v27, %v163_v26 }
  0xb9   :  { %242 = vmatmul.bf16.vlgmr.msra.gmra.mxu1 %v165_v28 }
 0x136   :  { %v243_v33 = vpop.f32.mrf.mxu1 }
 0x137   :  { %v244_v35 = vadd.f32 %v479_v34, %v243_v33 }
 0x139   :  { %v248_v38 = vmax.f32 %v244_v35, 0.0 }
 0x13e   :  { %v245_v36 = vpop.f32.mrf.mxu1 }
 0x13f   :  { %v246_v37 = vadd.f32 %v479_v34, %v245_v36 }
 0x141   :  { %v249_v39 = vmax.f32 %v246_v37, 0.0 }
 0x143   :  { %v250_v40 = vpack.c.bf16 %v249_v39, %v248_v38 }
 0x145   :  { %327 = vmatmul.bf16.vlgmr.msra.gmra.mxu2 %v250_v40 }
 0x1c8   :  { %v328_v41 = vpop.f32.mrf.mxu2 }
 0x1c9   :  { %v329_v44 = vadd.f32 %v480_v42, %v328_v41 }
 0x1d0   :  { %v330_v43 = vpop.f32.mrf.mxu2 }
 0x1d1   :  { %v331_v45 = vadd.f32 %v480_v42, %v330_v43 }
 0x1d3   :  { %v471_v46 = vpack.c.bf16 %v331_v45, %v329_v44 }
 0x1d5   :  { %472 = vst [vmem:[%s633_s7] sm:$0xff] %v471_v46  }
 0x1d6   :  { %341 = vsyncpa [#allocation3], 1 }
 0x1d7   :  { %342 = vsyncpa [#allocation5], 1 }

</bundles_post_ra>
